<compile_context>
chip_gen: v7x
topology: tpu7x:2x2x1
jax: 0.10.0
libtpu: 0.0.40
codegen_flags: <defaults>
</compile_context>

<pallas_src>
import functools

import jax
import jax.numpy as jnp
import numpy as np
from jax import lax
from jax.experimental import pallas as pl
from jax.experimental.pallas import tpu as pltpu


# --------------------------------- kernel ----------------------------------

def _convblock_kernel(*refs, W, res_conv, matmul_dtype):
    if res_conv:
        (x_ref, mask_ref, w1_ref, b1_ref, w2_ref, b2_ref, w3_ref, b3_ref,
         wres_ref, bres_ref, o_ref, o2_ref) = refs
    else:
        (x_ref, mask_ref, w1_ref, b1_ref, w2_ref, b2_ref, w3_ref, b3_ref,
         o_ref, o2_ref) = refs

    f32 = jnp.float32
    HWp = x_ref.shape[2]                       # lane extent (128-multiple)

    x2d = x_ref[0]                             # (Cin, HWp) f32, channels on sublanes
    x2d_m = x2d.astype(matmul_dtype)           # bf16 at the MXU, f32 accumulation

    # ---- conv1: 1x1 (BN folded) + ReLU -> (cp, HWp)
    h1 = jnp.dot(w1_ref[...], x2d_m, preferred_element_type=f32) + b1_ref[...]
    h1 = jnp.maximum(h1, 0.0)

    # ---- conv2: 3x3, stride 1, pad 1 (BN folded) + ReLU as ONE K=9*cp matmul.
    # Each tap is an XLU lane rotation of h1; the precomputed (1, HWp) validity
    # mask zeroes lanes whose source pixel is outside the image (halo / lane
    # padding), which is exactly zero-padding semantics.
    taps = []
    t = 0
    for dy in (-1, 0, 1):
        for dx in (-1, 0, 1):
            s = dy * W + dx                    # tap source offset in flat HW
            rolled = h1 if s == 0 else pltpu.roll(h1, (-s) % HWp, axis=1)
            taps.append(rolled * mask_ref[t:t + 1, :])   # f32 mask multiply (VPU)
            t += 1
    slab = jnp.concatenate(taps, axis=0)       # (9*cp, HWp) f32, sublane-aligned

    h2 = (jnp.dot(w2_ref[...], slab.astype(matmul_dtype),
                  preferred_element_type=f32) + b2_ref[...])
    h2 = jnp.maximum(h2, 0.0)
    o2_ref[0] = h2.astype(o2_ref.dtype)        # x2 output (lane-dense store)

    # ---- conv3: 1x1 (BN folded), no activation
    h3 = (jnp.dot(w3_ref[...], h2.astype(matmul_dtype),
                  preferred_element_type=f32) + b3_ref[...])

    # ---- residual path
    if res_conv:
        res = (jnp.dot(wres_ref[...], x2d_m, preferred_element_type=f32)
               + bres_ref[...])
    else:
        res = x2d                              # identity (Cin == Cout asserted)

    # ---- add + final ReLU (f32 VPU), lane-dense store
    o_ref[0] = jnp.maximum(h3 + res, 0.0).astype(o_ref.dtype)


# --------------------------------- wrapper ---------------------------------

def convblock_forward(x_nchw, kp, *, res_conv=True, return_x_2=True,
                      matmul_dtype=jnp.bfloat16):
    """x_nchw: (N, Cin, H, W) float.  Returns (x, x2) in NCHW (reshapes only)."""
    N, Cin, H, W = x_nchw.shape
    HW = H * W
    HWp = ((HW + 127) // 128) * 128            # lane-dense stores for any H, W
    c, cp = kp["c"], kp["c_pad"]
    Cout = kp["b3"].shape[0]
    if not res_conv:
        assert Cin == Cout, "identity residual requires in_channels == out_channels"

    x = x_nchw.reshape(N, Cin, HW).astype(jnp.float32)
    if HWp != HW:
        x = jnp.pad(x, ((0, 0), (0, 0), (0, HWp - HW)))

    # Per-tap halo-validity masks, built once on host; lanes >= HW (padding)
    # and out-of-image neighbours are 0.  Resident in VMEM across the grid.
    idx = np.arange(HWp, dtype=np.int64)
    ys, xs = idx // W, idx % W
    in_img = idx < HW
    mask9 = np.stack([
        (in_img & (ys + dy >= 0) & (ys + dy < H) & (xs + dx >= 0) & (xs + dx < W))
        for dy in (-1, 0, 1) for dx in (-1, 0, 1)
    ]).astype(np.float32)
    mask9 = jnp.asarray(mask9)                 # (9, HWp)

    def const_spec(shape):
        nd = len(shape)
        return pl.BlockSpec(shape, lambda n, _nd=nd: (0,) * _nd)

    in_specs = [
        pl.BlockSpec((1, Cin, HWp), lambda n: (n, 0, 0)),
        const_spec((9, HWp)),
        const_spec((cp, Cin)), const_spec((cp, 1)),        # conv1 (BN folded)
        const_spec((cp, 9 * cp)), const_spec((cp, 1)),     # conv2 im2col weight
        const_spec((Cout, cp)), const_spec((Cout, 1)),     # conv3
    ]
    args = [x, mask9, kp["w1"], kp["b1"], kp["w2"], kp["b2"], kp["w3"], kp["b3"]]
    if res_conv:                               # only keep residual weights resident
        in_specs += [const_spec((Cout, Cin)), const_spec((Cout, 1))]
        args += [kp["wres"], kp["bres"]]

    kernel = functools.partial(_convblock_kernel, W=W, res_conv=res_conv,
                               matmul_dtype=matmul_dtype)

    grid_spec = pltpu.PrefetchScalarGridSpec(
        num_scalar_prefetch=0,
        grid=(N,),
        in_specs=in_specs,
        out_specs=[
            pl.BlockSpec((1, Cout, HWp), lambda n: (n, 0, 0)),
            pl.BlockSpec((1, cp, HWp), lambda n: (n, 0, 0)),
        ],
    )

    out_p, x2_p = pl.pallas_call(
        kernel,
        out_shape=(jax.ShapeDtypeStruct((N, Cout, HWp), jnp.float32),
                   jax.ShapeDtypeStruct((N, cp, HWp), jnp.float32)),
        grid_spec=grid_spec,
        compiler_params=pltpu.CompilerParams(dimension_semantics=("parallel",)),
    )(*args)

    out = out_p[:, :, :HW].reshape(N, Cout, H, W)
    if not return_x_2:
        return out
    x2 = x2_p[:, :c, :HW].reshape(N, c, H, W)
    return out, x2


# ------------------------- parameters & BN folding -------------------------

def _bn_params(key, ch):
    k1, k2, k3, k4 = jax.random.split(key, 4)
    return {
        "gamma": 1.0 + 0.1 * jax.random.normal(k1, (ch,), dtype=jnp.float32),
        "beta": 0.1 * jax.random.normal(k2, (ch,), dtype=jnp.float32),
        "mean": 0.1 * jax.random.normal(k3, (ch,), dtype=jnp.float32),
        "var": jax.random.uniform(k4, (ch,), minval=0.5, maxval=1.5,
                                  dtype=jnp.float32),
    }


def make_params(key, in_channels, out_channels):
    """Deterministic synthetic ConvBlock parameters (PyTorch OIHW layout)."""
    c = out_channels // 4
    ks = jax.random.split(key, 8)
    s = 0.3

    def w(k, shape):
        return s * jax.random.normal(k, shape, dtype=jnp.float32)

    return {
        "w1": w(ks[0], (c, in_channels, 1, 1)),        "bn1": _bn_params(ks[1], c),
        "w2": w(ks[2], (c, c, 3, 3)),                  "bn2": _bn_params(ks[3], c),
        "w3": w(ks[4], (out_channels, c, 1, 1)),       "bn3": _bn_params(ks[5], out_channels),
        "wres": w(ks[6], (out_channels, in_channels, 1, 1)),
        "bnres": _bn_params(ks[7], out_channels),
    }


def _fold_conv_bn(w_oihw, bn, eps):
    scale = bn["gamma"] / jnp.sqrt(bn["var"] + eps)
    w_f = w_oihw * scale[:, None, None, None]
    b_f = bn["beta"] - bn["mean"] * scale
    return w_f, b_f


def kernel_params(p, *, matmul_dtype=jnp.bfloat16, pad_to=8):
    """Fold eval-mode BN into the convs, zero-pad the bottleneck width c to a
    sublane-friendly multiple, cast matmul operands to `matmul_dtype`, and
    reshape to the (Cout, K) kernel layouts.  (At production widths pad the
    contraction dims toward 128 on v5e / 256 on v6e+v7x instead of 8.)"""
    eps_bn = 1e-5    # nn.BatchNorm2d default (inside Conv)
    eps_res = 1e-6   # norm_layer=partial(nn.BatchNorm2d, eps=1e-6)
    w1, b1 = _fold_conv_bn(p["w1"], p["bn1"], eps_bn)
    w2, b2 = _fold_conv_bn(p["w2"], p["bn2"], eps_bn)
    w3, b3 = _fold_conv_bn(p["w3"], p["bn3"], eps_bn)
    c, cin = w1.shape[0], w1.shape[1]
    cout = w3.shape[0]
    cp = max(pad_to, -(-c // pad_to) * pad_to)
    pad_c = cp - c

    w1p = jnp.pad(w1.reshape(c, cin), ((0, pad_c), (0, 0)))
    b1p = jnp.pad(b1.reshape(c, 1), ((0, pad_c), (0, 0)))
    # (O, I, kh, kw) -> pad O and I to cp -> (O, kh, kw, I) -> (O, 9*I):
    # tap-major / channel-minor, matching the slab built in the kernel.
    w2p = jnp.pad(w2, ((0, pad_c), (0, pad_c), (0, 0), (0, 0)))
    w2p = jnp.transpose(w2p, (0, 2, 3, 1)).reshape(cp, 9 * cp)
    b2p = jnp.pad(b2.reshape(c, 1), ((0, pad_c), (0, 0)))
    w3p = jnp.pad(w3.reshape(cout, c), ((0, 0), (0, pad_c)))

    kp = {
        "w1": w1p.astype(matmul_dtype), "b1": b1p.astype(jnp.float32),
        "w2": w2p.astype(matmul_dtype), "b2": b2p.astype(jnp.float32),
        "w3": w3p.astype(matmul_dtype), "b3": b3.reshape(cout, 1).astype(jnp.float32),
        "c": c, "c_pad": cp,
    }
    if "wres" in p:
        wr, br = _fold_conv_bn(p["wres"], p["bnres"], eps_res)
        kp["wres"] = wr.reshape(cout, cin).astype(matmul_dtype)
        kp["bres"] = br.reshape(cout, 1).astype(jnp.float32)
    return kp


# ------------------------------ references ---------------------------------

def convblock_matched_reference(x_nchw, kp, *, res_conv=True,
                                matmul_dtype=jnp.bfloat16):
    """Pure-JAX reference with the kernel's exact numerics (folded BN, padded
    channels, bf16 matmul operands, f32 accumulation)."""
    N, Cin, H, W = x_nchw.shape
    HW = H * W
    cp = kp["c_pad"]
    cout = kp["b3"].shape[0]

    def mm(w, a):   # (O, K) x (N, K, HW) -> (N, O, HW), f32 accumulation
        return jnp.einsum("ok,nkp->nop", w.astype(matmul_dtype),
                          a.astype(matmul_dtype),
                          preferred_element_type=jnp.float32)

    x2d = x_nchw.reshape(N, Cin, HW).astype(jnp.float32)
    h1 = jax.nn.relu(mm(kp["w1"], x2d) + kp["b1"][None])
    h1p = jnp.pad(h1.reshape(N, cp, H, W), ((0, 0), (0, 0), (1, 1), (1, 1)))
    slab = jnp.concatenate(
        [h1p[:, :, dy:dy + H, dx:dx + W] for dy in range(3) for dx in range(3)],
        axis=1).reshape(N, 9 * cp, HW)
    h2 = jax.nn.relu(mm(kp["w2"], slab) + kp["b2"][None])
    h3 = mm(kp["w3"], h2) + kp["b3"][None]
    res = (mm(kp["wres"], x2d) + kp["bres"][None]) if res_conv else x2d
    out = jax.nn.relu(h3 + res)
    return (out.reshape(N, cout, H, W),
            h2.reshape(N, cp, H, W)[:, :kp["c"]])


def convblock_reference(x, p, *, res_conv=True):
    """Mirrors ConvBlock.forward (eval-mode BatchNorm), NCHW convolutions, f32."""
    def conv(inp, w, stride=1, pad=0):
        return lax.conv_general_dilated(
            inp, w, (stride, stride), [(pad, pad), (pad, pad)],
            dimension_numbers=("NCHW", "OIHW", "NCHW"))

    def bn(inp, b, eps):
        g = b["gamma"][None, :, None, None]
        be = b["beta"][None, :, None, None]
        m = b["mean"][None, :, None, None]
        v = b["var"][None, :, None, None]
        return g * (inp - m) / jnp.sqrt(v + eps) + be

    h1 = jax.nn.relu(bn(conv(x, p["w1"]), p["bn1"], 1e-5))
    x2 = jax.nn.relu(bn(conv(h1, p["w2"], pad=1), p["bn2"], 1e-5))
    h3 = bn(conv(x2, p["w3"]), p["bn3"], 1e-5)
    res = bn(conv(x, p["wres"]), p["bnres"], 1e-6) if res_conv else x
    out = jax.nn.relu(h3 + res)
    return out, x2


# ----------------------------------- demo -----------------------------------

if __name__ == "__main__":
    # Small shapes consistent with the module: expansion=4 -> c = out_channels // 4.
    N, Cin, Cout, H, W = 2, 8, 16, 16, 16

    key = jax.random.PRNGKey(0)
    kx, kparam = jax.random.split(key)
    x = jax.random.normal(kx, (N, Cin, H, W), dtype=jnp.float32)

    params = make_params(kparam, Cin, Cout)
    kpar = kernel_params(params)                       # BN folded, bf16 weights

    out, x2 = convblock_forward(x, kpar, res_conv=True)
    out = jax.block_until_ready(out)
    x2 = jax.block_until_ready(x2)
    assert out.shape == (N, Cout, H, W)
    assert x2.shape == (N, Cout // 4, H, W)

    # (1) Tight check vs a pure-JAX reference with the kernel's exact numerics
    #     (folded BN, bf16 matmul operands, f32 accumulation).
    m_out, m_x2 = convblock_matched_reference(x, kpar, res_conv=True)
    err_m_out = float(jnp.max(jnp.abs(out - m_out)))
    err_m_x2 = float(jnp.max(jnp.abs(x2 - m_x2)))
    assert err_m_out < 1e-3 and err_m_x2 < 1e-3, (
        "mismatch vs matched reference: %g / %g" % (err_m_out, err_m_x2))

    # (2) Sanity check vs the f32 module reference; tolerance budgets the bf16
    #     operand quantization, relative to the output scale.
    r_out, r_x2 = convblock_reference(x, params, res_conv=True)
    rel_out = float(jnp.max(jnp.abs(out - r_out))
                    / jnp.maximum(1.0, jnp.max(jnp.abs(r_out))))
    rel_x2 = float(jnp.max(jnp.abs(x2 - r_x2))
                   / jnp.maximum(1.0, jnp.max(jnp.abs(r_x2))))
    assert rel_out < 5e-2 and rel_x2 < 5e-2, (
        "mismatch vs f32 module reference: rel_out=%g rel_x2=%g" % (rel_out, rel_x2))

    print("KERNEL_OK")
</pallas_src>

<mosaic_0001>
module attributes {stable_mosaic.version = 11 : i64} {
  func.func @_convblock_kernel(%arg0: i32, %arg1: memref<1x8x256xf32, #tpu.memory_space<vmem>>, %arg2: memref<9x256xf32, #tpu.memory_space<vmem>>, %arg3: memref<8x8xbf16, #tpu.memory_space<vmem>>, %arg4: memref<8x1xf32, #tpu.memory_space<vmem>>, %arg5: memref<8x72xbf16, #tpu.memory_space<vmem>>, %arg6: memref<8x1xf32, #tpu.memory_space<vmem>>, %arg7: memref<16x8xbf16, #tpu.memory_space<vmem>>, %arg8: memref<16x1xf32, #tpu.memory_space<vmem>>, %arg9: memref<16x8xbf16, #tpu.memory_space<vmem>>, %arg10: memref<16x1xf32, #tpu.memory_space<vmem>>, %arg11: memref<1x16x256xf32, #tpu.memory_space<vmem>>, %arg12: memref<1x8x256xf32, #tpu.memory_space<vmem>>) attributes {dimension_semantics = [#tpu.dimension_semantics<parallel>], iteration_bounds = array<i64: 2>, scalar_prefetch = 0 : i64, scratch_operands = 0 : i64, tpu.core_type = #tpu.core_type<tc>, window_params = [{transform_indices = @transform_0, window_bounds = array<i64: 1, 8, 256>}, {pipeline_mode = #tpu.pipeline_mode<synchronous>, transform_indices = @transform_1, window_bounds = array<i64: 9, 256>}, {pipeline_mode = #tpu.pipeline_mode<synchronous>, transform_indices = @transform_2, window_bounds = array<i64: 8, 8>}, {pipeline_mode = #tpu.pipeline_mode<synchronous>, transform_indices = @transform_3, window_bounds = array<i64: 8, 1>}, {pipeline_mode = #tpu.pipeline_mode<synchronous>, transform_indices = @transform_4, window_bounds = array<i64: 8, 72>}, {pipeline_mode = #tpu.pipeline_mode<synchronous>, transform_indices = @transform_5, window_bounds = array<i64: 8, 1>}, {pipeline_mode = #tpu.pipeline_mode<synchronous>, transform_indices = @transform_6, window_bounds = array<i64: 16, 8>}, {pipeline_mode = #tpu.pipeline_mode<synchronous>, transform_indices = @transform_7, window_bounds = array<i64: 16, 1>}, {pipeline_mode = #tpu.pipeline_mode<synchronous>, transform_indices = @transform_8, window_bounds = array<i64: 16, 8>}, {pipeline_mode = #tpu.pipeline_mode<synchronous>, transform_indices = @transform_9, window_bounds = array<i64: 16, 1>}, {transform_indices = @transform_10, window_bounds = array<i64: 1, 16, 256>}, {transform_indices = @transform_11, window_bounds = array<i64: 1, 8, 256>}]} {
    %c0 = arith.constant 0 : index
    %c0_0 = arith.constant 0 : index
    %c0_1 = arith.constant 0 : index
    %0 = vector.load %arg1[%c0, %c0_0, %c0_1] : memref<1x8x256xf32, #tpu.memory_space<vmem>>, vector<1x8x256xf32>
    %1 = vector.shape_cast %0 : vector<1x8x256xf32> to vector<8x256xf32>
    %2 = arith.truncf %1 : vector<8x256xf32> to vector<8x256xbf16>
    %c0_2 = arith.constant 0 : index
    %c0_3 = arith.constant 0 : index
    %3 = vector.load %arg3[%c0_2, %c0_3] : memref<8x8xbf16, #tpu.memory_space<vmem>>, vector<8x8xbf16>
    %cst = arith.constant dense<0.000000e+00> : vector<8x256xf32>
    %4 = tpu.matmul %3, %2, %cst {dimension_numbers = #tpu.dot_dimension_numbers<[1], [0], [0], [1], [0, 0, 1, 1], [], []>} : vector<8x8xbf16>, vector<8x256xbf16>, vector<8x256xf32> -> vector<8x256xf32>
    %c0_4 = arith.constant 0 : index
    %c0_5 = arith.constant 0 : index
    %5 = vector.load %arg4[%c0_4, %c0_5] : memref<8x1xf32, #tpu.memory_space<vmem>>, vector<8x1xf32>
    %6 = vector.broadcast %5 : vector<8x1xf32> to vector<8x256xf32>
    %7 = arith.addf %4, %6 : vector<8x256xf32>
    %cst_6 = arith.constant 0.000000e+00 : f32
    %8 = vector.broadcast %cst_6 : f32 to vector<8x256xf32>
    %9 = arith.maximumf %7, %8 : vector<8x256xf32>
    %c17_i32 = arith.constant 17 : i32
    %10 = tpu.dynamic_rotate %9 by %c17_i32 dim 1 : vector<8x256xf32>, i32 -> vector<8x256xf32>
    %c0_7 = arith.constant 0 : index
    %c0_8 = arith.constant 0 : index
    %11 = vector.load %arg2[%c0_7, %c0_8] : memref<9x256xf32, #tpu.memory_space<vmem>>, vector<1x256xf32>
    %12 = vector.broadcast %11 : vector<1x256xf32> to vector<8x256xf32>
    %13 = arith.mulf %10, %12 : vector<8x256xf32>
    %c16_i32 = arith.constant 16 : i32
    %14 = tpu.dynamic_rotate %9 by %c16_i32 dim 1 : vector<8x256xf32>, i32 -> vector<8x256xf32>
    %c1 = arith.constant 1 : index
    %c0_9 = arith.constant 0 : index
    %15 = vector.load %arg2[%c1, %c0_9] : memref<9x256xf32, #tpu.memory_space<vmem>>, vector<1x256xf32>
    %16 = vector.broadcast %15 : vector<1x256xf32> to vector<8x256xf32>
    %17 = arith.mulf %14, %16 : vector<8x256xf32>
    %c15_i32 = arith.constant 15 : i32
    %18 = tpu.dynamic_rotate %9 by %c15_i32 dim 1 : vector<8x256xf32>, i32 -> vector<8x256xf32>
    %c2 = arith.constant 2 : index
    %c0_10 = arith.constant 0 : index
    %19 = vector.load %arg2[%c2, %c0_10] : memref<9x256xf32, #tpu.memory_space<vmem>>, vector<1x256xf32>
    %20 = vector.broadcast %19 : vector<1x256xf32> to vector<8x256xf32>
    %21 = arith.mulf %18, %20 : vector<8x256xf32>
    %c1_i32 = arith.constant 1 : i32
    %22 = tpu.dynamic_rotate %9 by %c1_i32 dim 1 : vector<8x256xf32>, i32 -> vector<8x256xf32>
    %c3 = arith.constant 3 : index
    %c0_11 = arith.constant 0 : index
    %23 = vector.load %arg2[%c3, %c0_11] : memref<9x256xf32, #tpu.memory_space<vmem>>, vector<1x256xf32>
    %24 = vector.broadcast %23 : vector<1x256xf32> to vector<8x256xf32>
    %25 = arith.mulf %22, %24 : vector<8x256xf32>
    %c4 = arith.constant 4 : index
    %c0_12 = arith.constant 0 : index
    %26 = vector.load %arg2[%c4, %c0_12] : memref<9x256xf32, #tpu.memory_space<vmem>>, vector<1x256xf32>
    %27 = vector.broadcast %26 : vector<1x256xf32> to vector<8x256xf32>
    %28 = arith.mulf %9, %27 : vector<8x256xf32>
    %c255_i32 = arith.constant 255 : i32
    %29 = tpu.dynamic_rotate %9 by %c255_i32 dim 1 : vector<8x256xf32>, i32 -> vector<8x256xf32>
    %c5 = arith.constant 5 : index
    %c0_13 = arith.constant 0 : index
    %30 = vector.load %arg2[%c5, %c0_13] : memref<9x256xf32, #tpu.memory_space<vmem>>, vector<1x256xf32>
    %31 = vector.broadcast %30 : vector<1x256xf32> to vector<8x256xf32>
    %32 = arith.mulf %29, %31 : vector<8x256xf32>
    %c241_i32 = arith.constant 241 : i32
    %33 = tpu.dynamic_rotate %9 by %c241_i32 dim 1 : vector<8x256xf32>, i32 -> vector<8x256xf32>
    %c6 = arith.constant 6 : index
    %c0_14 = arith.constant 0 : index
    %34 = vector.load %arg2[%c6, %c0_14] : memref<9x256xf32, #tpu.memory_space<vmem>>, vector<1x256xf32>
    %35 = vector.broadcast %34 : vector<1x256xf32> to vector<8x256xf32>
    %36 = arith.mulf %33, %35 : vector<8x256xf32>
    %c240_i32 = arith.constant 240 : i32
    %37 = tpu.dynamic_rotate %9 by %c240_i32 dim 1 : vector<8x256xf32>, i32 -> vector<8x256xf32>
    %c7 = arith.constant 7 : index
    %c0_15 = arith.constant 0 : index
    %38 = vector.load %arg2[%c7, %c0_15] : memref<9x256xf32, #tpu.memory_space<vmem>>, vector<1x256xf32>
    %39 = vector.broadcast %38 : vector<1x256xf32> to vector<8x256xf32>
    %40 = arith.mulf %37, %39 : vector<8x256xf32>
    %c239_i32 = arith.constant 239 : i32
    %41 = tpu.dynamic_rotate %9 by %c239_i32 dim 1 : vector<8x256xf32>, i32 -> vector<8x256xf32>
    %c8 = arith.constant 8 : index
    %c0_16 = arith.constant 0 : index
    %42 = vector.load %arg2[%c8, %c0_16] : memref<9x256xf32, #tpu.memory_space<vmem>>, vector<1x256xf32>
    %43 = vector.broadcast %42 : vector<1x256xf32> to vector<8x256xf32>
    %44 = arith.mulf %41, %43 : vector<8x256xf32>
    %45 = tpu.concatenate %13, %17, %21, %25, %28, %32, %36, %40, %44 in 0 : vector<8x256xf32>, vector<8x256xf32>, vector<8x256xf32>, vector<8x256xf32>, vector<8x256xf32>, vector<8x256xf32>, vector<8x256xf32>, vector<8x256xf32>, vector<8x256xf32> -> vector<72x256xf32>
    %c0_17 = arith.constant 0 : index
    %c0_18 = arith.constant 0 : index
    %46 = vector.load %arg5[%c0_17, %c0_18] : memref<8x72xbf16, #tpu.memory_space<vmem>>, vector<8x72xbf16>
    %47 = arith.truncf %45 : vector<72x256xf32> to vector<72x256xbf16>
    %cst_19 = arith.constant dense<0.000000e+00> : vector<8x256xf32>
    %48 = tpu.matmul %46, %47, %cst_19 {dimension_numbers = #tpu.dot_dimension_numbers<[1], [0], [0], [1], [0, 0, 1, 1], [], []>} : vector<8x72xbf16>, vector<72x256xbf16>, vector<8x256xf32> -> vector<8x256xf32>
    %c0_20 = arith.constant 0 : index
    %c0_21 = arith.constant 0 : index
    %49 = vector.load %arg6[%c0_20, %c0_21] : memref<8x1xf32, #tpu.memory_space<vmem>>, vector<8x1xf32>
    %50 = vector.broadcast %49 : vector<8x1xf32> to vector<8x256xf32>
    %51 = arith.addf %48, %50 : vector<8x256xf32>
    %cst_22 = arith.constant 0.000000e+00 : f32
    %52 = vector.broadcast %cst_22 : f32 to vector<8x256xf32>
    %53 = arith.maximumf %51, %52 : vector<8x256xf32>
    %c0_23 = arith.constant 0 : index
    %c0_24 = arith.constant 0 : index
    %c0_25 = arith.constant 0 : index
    %54 = vector.load %arg12[%c0_23, %c0_24, %c0_25] : memref<1x8x256xf32, #tpu.memory_space<vmem>>, vector<1x8x256xf32>
    %55 = vector.shape_cast %54 : vector<1x8x256xf32> to vector<8x256xf32>
    %56 = vector.shape_cast %53 : vector<8x256xf32> to vector<1x8x256xf32>
    tpu.vector_store %arg12[%c0_23, %c0_24, %c0_25], %56 {strides = array<i32>} : memref<1x8x256xf32, #tpu.memory_space<vmem>>, vector<1x8x256xf32>,
    %c0_26 = arith.constant 0 : index
    %c0_27 = arith.constant 0 : index
    %57 = vector.load %arg7[%c0_26, %c0_27] : memref<16x8xbf16, #tpu.memory_space<vmem>>, vector<16x8xbf16>
    %58 = arith.truncf %53 : vector<8x256xf32> to vector<8x256xbf16>
    %cst_28 = arith.constant dense<0.000000e+00> : vector<16x256xf32>
    %59 = tpu.matmul %57, %58, %cst_28 {dimension_numbers = #tpu.dot_dimension_numbers<[1], [0], [0], [1], [0, 0, 1, 1], [], []>} : vector<16x8xbf16>, vector<8x256xbf16>, vector<16x256xf32> -> vector<16x256xf32>
    %c0_29 = arith.constant 0 : index
    %c0_30 = arith.constant 0 : index
    %60 = vector.load %arg8[%c0_29, %c0_30] : memref<16x1xf32, #tpu.memory_space<vmem>>, vector<16x1xf32>
    %61 = vector.broadcast %60 : vector<16x1xf32> to vector<16x256xf32>
    %62 = arith.addf %59, %61 : vector<16x256xf32>
    %c0_31 = arith.constant 0 : index
    %c0_32 = arith.constant 0 : index
    %63 = vector.load %arg9[%c0_31, %c0_32] : memref<16x8xbf16, #tpu.memory_space<vmem>>, vector<16x8xbf16>
    %cst_33 = arith.constant dense<0.000000e+00> : vector<16x256xf32>
    %64 = tpu.matmul %63, %2, %cst_33 {dimension_numbers = #tpu.dot_dimension_numbers<[1], [0], [0], [1], [0, 0, 1, 1], [], []>} : vector<16x8xbf16>, vector<8x256xbf16>, vector<16x256xf32> -> vector<16x256xf32>
    %c0_34 = arith.constant 0 : index
    %c0_35 = arith.constant 0 : index
    %65 = vector.load %arg10[%c0_34, %c0_35] : memref<16x1xf32, #tpu.memory_space<vmem>>, vector<16x1xf32>
    %66 = vector.broadcast %65 : vector<16x1xf32> to vector<16x256xf32>
    %67 = arith.addf %64, %66 : vector<16x256xf32>
    %68 = arith.addf %62, %67 : vector<16x256xf32>
    %cst_36 = arith.constant 0.000000e+00 : f32
    %69 = vector.broadcast %cst_36 : f32 to vector<16x256xf32>
    %70 = arith.maximumf %68, %69 : vector<16x256xf32>
    %c0_37 = arith.constant 0 : index
    %c0_38 = arith.constant 0 : index
    %c0_39 = arith.constant 0 : index
    %71 = vector.load %arg11[%c0_37, %c0_38, %c0_39] : memref<1x16x256xf32, #tpu.memory_space<vmem>>, vector<1x16x256xf32>
    %72 = vector.shape_cast %71 : vector<1x16x256xf32> to vector<16x256xf32>
    %73 = vector.shape_cast %70 : vector<16x256xf32> to vector<1x16x256xf32>
    tpu.vector_store %arg11[%c0_37, %c0_38, %c0_39], %73 {strides = array<i32>} : memref<1x16x256xf32, #tpu.memory_space<vmem>>, vector<1x16x256xf32>,
    return
  }
  func.func @transform_0(%arg0: i32) -> (i32, i32, i32) {
    %c0_i32 = arith.constant 0 : i32
    %c0_i32_0 = arith.constant 0 : i32
    %c0_i32_1 = arith.constant 0 : i32
    return %arg0, %c0_i32, %c0_i32_0 : i32, i32, i32
  }
  func.func @transform_1(%arg0: i32) -> (i32, i32) {
    %c0_i32 = arith.constant 0 : i32
    %c0_i32_0 = arith.constant 0 : i32
    %c0_i32_1 = arith.constant 0 : i32
    return %c0_i32, %c0_i32_0 : i32, i32
  }
  func.func @transform_2(%arg0: i32) -> (i32, i32) {
    %c0_i32 = arith.constant 0 : i32
    %c0_i32_0 = arith.constant 0 : i32
    %c0_i32_1 = arith.constant 0 : i32
    return %c0_i32, %c0_i32_0 : i32, i32
  }
  func.func @transform_3(%arg0: i32) -> (i32, i32) {
    %c0_i32 = arith.constant 0 : i32
    %c0_i32_0 = arith.constant 0 : i32
    %c0_i32_1 = arith.constant 0 : i32
    return %c0_i32, %c0_i32_0 : i32, i32
  }
  func.func @transform_4(%arg0: i32) -> (i32, i32) {
    %c0_i32 = arith.constant 0 : i32
    %c0_i32_0 = arith.constant 0 : i32
    %c0_i32_1 = arith.constant 0 : i32
    return %c0_i32, %c0_i32_0 : i32, i32
  }
  func.func @transform_5(%arg0: i32) -> (i32, i32) {
    %c0_i32 = arith.constant 0 : i32
    %c0_i32_0 = arith.constant 0 : i32
    %c0_i32_1 = arith.constant 0 : i32
    return %c0_i32, %c0_i32_0 : i32, i32
  }
  func.func @transform_6(%arg0: i32) -> (i32, i32) {
    %c0_i32 = arith.constant 0 : i32
    %c0_i32_0 = arith.constant 0 : i32
    %c0_i32_1 = arith.constant 0 : i32
    return %c0_i32, %c0_i32_0 : i32, i32
  }
  func.func @transform_7(%arg0: i32) -> (i32, i32) {
    %c0_i32 = arith.constant 0 : i32
    %c0_i32_0 = arith.constant 0 : i32
    %c0_i32_1 = arith.constant 0 : i32
    return %c0_i32, %c0_i32_0 : i32, i32
  }
  func.func @transform_8(%arg0: i32) -> (i32, i32) {
    %c0_i32 = arith.constant 0 : i32
    %c0_i32_0 = arith.constant 0 : i32
    %c0_i32_1 = arith.constant 0 : i32
    return %c0_i32, %c0_i32_0 : i32, i32
  }
  func.func @transform_9(%arg0: i32) -> (i32, i32) {
    %c0_i32 = arith.constant 0 : i32
    %c0_i32_0 = arith.constant 0 : i32
    %c0_i32_1 = arith.constant 0 : i32
    return %c0_i32, %c0_i32_0 : i32, i32
  }
  func.func @transform_10(%arg0: i32) -> (i32, i32, i32) {
    %c0_i32 = arith.constant 0 : i32
    %c0_i32_0 = arith.constant 0 : i32
    %c0_i32_1 = arith.constant 0 : i32
    return %arg0, %c0_i32, %c0_i32_0 : i32, i32, i32
  }
  func.func @transform_11(%arg0: i32) -> (i32, i32, i32) {
    %c0_i32 = arith.constant 0 : i32
    %c0_i32_0 = arith.constant 0 : i32
    %c0_i32_1 = arith.constant 0 : i32
    return %arg0, %c0_i32, %c0_i32_0 : i32, i32, i32
  }
}

</mosaic_0001>

<bundles_post_ra>
// kernel: tpu_custom_call.1
= control target key start
LH: loop header
LB: loop body
LE: loop exit
PB: predicated region body
PF: predicated region fallthrough
CT: control target
= control target key end

     0   :  { %s1567_s0 = inlined_call_operand.vmem [shape: f32[2,8,256], index: 0, kind: input, shape index: {}]   ;;  %s1568_s1 = inlined_call_operand.vmem [shape: f32[9,256], index: 1, kind: input, shape index: {}]   ;;  %s1569_s2 = inlined_call_operand.vmem [shape: bf16[8,8], index: 2, kind: input, shape index: {}]   ;;  %s1570_s3 = inlined_call_operand.vmem [shape: f32[8,1], index: 3, kind: input, shape index: {}]   ;;  %s1571_s4 = inlined_call_operand.vmem [shape: bf16[8,72], index: 4, kind: input, shape index: {}]   ;;  %s1572_s5 = inlined_call_operand.vmem [shape: f32[8,1], index: 5, kind: input, shape index: {}]   ;;  %s1573_s6 = inlined_call_operand.vmem [shape: bf16[16,8], index: 6, kind: input, shape index: {}]   ;;  %s1574_s7 = inlined_call_operand.vmem [shape: f32[16,1], index: 7, kind: input, shape index: {}]   ;;  %s1575_s8 = inlined_call_operand.vmem [shape: bf16[16,8], index: 8, kind: input, shape index: {}]   ;;  %s1576_s9 = inlined_call_operand.vmem [shape: f32[16,1], index: 9, kind: input, shape index: {}]   ;;  %s1577_s10 = inlined_call_operand.hbm [shape: f32[2,16,256], index: 10, kind: output, shape index: {0}]   ;;  %s1578_s11 = inlined_call_operand.hbm [shape: f32[2,8,256], index: 11, kind: output, shape index: {1}]  }
   0x1   :  { %1580 = sst [smem:[#allocation8_spill]] %s1567_s0 }
   0x2   :  { %1581 = sst [smem:[#allocation9_spill]] %s1568_s1 }
   0x3   :  { %1582 = sst [smem:[#allocation10_spill]] %s1569_s2 }
   0x4   :  { %17 = vsyncpa [#allocation3], 0 }
   0x5   :  { %19 = vsyncpa [#allocation3 + $0x1], 0 }
   0x6   :  { %20 = vsyncpa [#allocation5], 0 }
   0x7   :  { %22 = vsyncpa [#allocation5 + $0x1], 0  ;;  %s1278_s17 = smov 0   ;;  %s1280_s18 = smov 0  }
   0x8   :  { %s1282_s19 = smov 0   ;;  %s1284_s20 = smov 0  }
   0x9 LB: > { %s1299_s21 = sadd.s32 4294967295, %s1204_s20   ;;  %s1003_s22 = sadd.s32 4294967294, %s1204_s20   ;;  %s1204_s20 = sphi %s1284_s20, %s1592_s20   ;;  %s1200_s19 = sphi %s1282_s19, %s1591_s19   ;;  %s1196_s18 = sphi %s1280_s18, %s1590_s18   ;;  %s1192_s17 = sphi %s1278_s17, %s1589_s17  }
   0xa   : > { %s1303_s23 = sadd.s32 1, %s1204_s20   ;;  %s250_s24 = sadd.s32 1, %s1200_s19 }
   0xb   : > { %s247_s25 = ssub.s32 %s1204_s20, %s1303_s23  ;;  %p260_p0 = scmp.ne.s32.totalorder %s1200_s19, %s1196_s18 }
   0xc   : > { %p248_p1 = scmp.eq.s32.totalorder %s247_s25, 0  ;;  %p261_p2 = scmp.eq.s32.totalorder %s1299_s21, 1 }
   0xd   : > { %p266_p3 = scmp.ne.s32.totalorder %s1196_s18, %s1192_s17  ;;  %p267_p4 = scmp.eq.s32.totalorder %s1003_s22, 1 }
   0xe   : > { %s1314_s26 = scalar_select %p248_p1, %s1200_s19, %s250_s24  }
   0xf   : > { %p1316_p5 = por %p261_p2, %p260_p0  ;;  %p1320_p6 = por %p267_p4, %p266_p3 }
  0x10   : > { %p1006_p7 = scmp.ge.s32.totalorder %s1204_s20, 1  ;;  %p346_p8 = scmp.lt.s32.totalorder %s1204_s20, 3 }
  0x12   : > { %p347_p9 = pnand %p1006_p7, %p346_p8 }
  0x13   : > { %p391_p10 = scmp.lt.s32.totalorder (!%p347_p9), %s1299_s21, 1  ;;  %v1206_v0 = vmov (!%p347_p9), 0   ;;  %v402_v1 = vld [vmem:[%s1570_s3] sm:$0xff] (!%p347_p9)  ;;  %s1585_s0 = sld [smem:[#allocation8_spill]] (!%p347_p9)  ;;  %vm412_vm0 = vcmask (!%p347_p9), 1043456   ;;  %vm408_vm1 = vcmask (!%p347_p9), 64512   ;;  %v466_v22 = vlaneseq (!%p347_p9) }
  0x14   : > { %350 = sbr.rel (%p347_p9) target bundleno = 875 (0x36b), region = 60  ;;  %451 = vmatprep.mubr.bf16.mxu0 (!%p347_p9), %v1206_v0  ;;  %1106 = vset.pattern.permute.xlu0 (!%p347_p9), %v1206_v0  ;;  %s1586_s2 = sld [smem:[#allocation10_spill]] (!%p347_p9)  ;;  %v730_v17 = vld [vmem:[%s1574_s7] sm:$0xff] (!%p347_p9)  ;;  %v731_v20 = vld [vmem:[%s1574_s7 + $0x8] sm:$0xff] (!%p347_p9)  ;;  %vm671_vm10 = vcmask (!%p347_p9), 588800  }
  0x15   : > { %405 = vperm.xlu0 (!%p347_p9), %1106, %v402_v1   ;;  %713 = vmatprep.mubr.bf16.mxu1 (!%p347_p9), %v1206_v0  ;;  %s1579_s25 = smov (!%p347_p9), 16   ;;  %s1208_s29 = smov (!%p347_p9), 17   ;;  %v801_v18 = vld [vmem:[%s1576_s9] sm:$0xff] (!%p347_p9)  ;;  %v802_v21 = vld [vmem:[%s1576_s9 + $0x8] sm:$0xff] (!%p347_p9)  ;;  %v1388_v25 = vand.u32 (!%p347_p9), 127, %v466_v22  ;;  %v474_v26 = vshrl.u32 (!%p347_p9), %v466_v22, 7 }
  0x16   : > { %1107 = vset.pattern.permute.xlu1 (!%p347_p9), %v1206_v0  ;;  %s1209_s30 = smov (!%p347_p9), 15   ;;  %s1212_s14 = smov (!%p347_p9), 113   ;;  %v665_v19 = vld [vmem:[%s1572_s5] sm:$0xff] (!%p347_p9) }
  0x17   : > { %s1213_s15 = smov (!%p347_p9), 112   ;;  %s1587_s1 = sld [smem:[#allocation9_spill]] (!%p347_p9)  ;;  %v1393_v30 = vsub.s32 (!%p347_p9), 0, %v474_v26  ;;  %v1395_v31 = vsub.s32 (!%p347_p9), 1, %v474_v26  ;;  %vm489_vm2 = vcmp.lt.s32.totalorder (!%p347_p9), %v1388_v25, 16  ;;  %vm511_vm3 = vcmp.lt.s32.totalorder (!%p347_p9), %v1388_v25, 15 }
  0x18   : > { %vm468_vm4 = vcmp.lt.s32.totalorder (!%p347_p9), %v1388_v25, 17  ;;  %vm533_vm5 = vcmp.lt.s32.totalorder (!%p347_p9), %v1388_v25, 1  ;;  %vm570_vm6 = vcmp.lt.s32.totalorder (!%p347_p9), %v1388_v25, 127  ;;  %vm592_vm7 = vcmp.lt.s32.totalorder (!%p347_p9), %v1388_v25, 113  ;;  %s1475_s22 = sand.u32 (!%p347_p9), 1, %s1196_s18  }
  0x19   : > { %vm614_vm8 = vcmp.lt.s32.totalorder (!%p347_p9), %v1388_v25, 112  ;;  %vm636_vm9 = vcmp.lt.s32.totalorder (!%p347_p9), %v1388_v25, 111  ;;  %s1008_s24 = sshll.u32 (!%p347_p9), %s1475_s22, 4 }
  0x1a   : > { %v401_v7 = vld [vmem:[%s1586_s2] sm:$0xf] (!%p347_p9) }
  0x1b   : > { %s392_s12 = scalar_select %p391_p10, %s1299_s21, 1 }
  0x1d   : > { %s1037_s13 = sshll.u32 %s392_s12, 4  ;;  %s1210_s12 = smov 1   ;;  %v1013_v29 = vld [vmem:[%s1587_s1 + $0x1] ss:$8 sm:$0x3] }
  0x1e   : > { %s395_s16 = scalar_lea.vmem %s1585_s0, %s1037_s13  ;;  %s1211_s13 = smov 127   ;;  %v471_v32 = vld [vmem:[%s1587_s1] ss:$8 sm:$0x3]  ;;  %v498_v34 = vrot.slane %v1013_v29, %v1393_v30  ;;  %v502_v38 = vrot.slane %v1013_v29, %v1395_v31 }
  0x1f   : > { %v398_v2 = vld [vmem:[%s395_s16 + $0x8] sm:$0xff]  ;;  %v397_v3 = vld [vmem:[%s395_s16] sm:$0xff]  ;;  %s1214_s16 = smov 111   ;;  %v476_v42 = vrot.slane %v471_v32, %v1393_v30  ;;  %v480_v44 = vrot.slane %v471_v32, %v1395_v31 }
  0x20   : > { %v1338_v4 = vpack.c.bf16 %v398_v2, %v398_v2  ;;  %v399_v5 = vpack.c.bf16 %v397_v3, %v397_v3  ;;  %v1015_v33 = vld [vmem:[%s1587_s1 + $0x3] ss:$8 sm:$0x3]  ;;  %v1014_v36 = vld [vmem:[%s1587_s1 + $0x2] ss:$8 sm:$0x3] }
  0x21   : > { %v1017_v41 = vld [vmem:[%s1587_s1 + $0x5] ss:$8 sm:$0x3]  ;;  %v546_v43 = vrot.slane %v1015_v33, %v1395_v31  ;;  %v524_v45 = vrot.slane %v1014_v36, %v1395_v31  ;;  %v542_v46 = vrot.slane %v1015_v33, %v1393_v30  ;;  %v1016_v52 = vld [vmem:[%s1587_s1 + $0x4] ss:$8 sm:$0x3]  ;;  %v520_v61 = vrot.slane %v1014_v36, %v1393_v30 }
  0x22   : > { %1011 = vmatprep.subr.msk.bf16.mxu0 %vm412_vm0, %v1338_v4  ;;  %v1343_v6 = vsel %vm412_vm0, %v399_v5, 0  ;;  %v583_v50 = vrot.slane %v1017_v41, %v1395_v31  ;;  %v561_v62 = vrot.slane %v1016_v52, %v1395_v31 }
  0x23   : > { %420 = vmatpush1.bf16.msra.mxu0 %v1343_v6 }
  0x26   : > { %1012 = vmatmul.mubr.msk.bf16.vlgmr.msra.gmra.mrb[0].mxu0 %vm408_vm1, %v401_v7 }
  0x27   : > { %788 = vmatprep.mubr.bf16.mxu0 %v1206_v0 }
  0x94   : > { %v406_v8 = vpop.permute.xlu0 %405 }
  0xf9   : > { %v453_v9 = vpop.f32.mrb[0].mxu0 }
  0xfa   : > { %v454_v10 = vadd.f32 %v453_v9, %v406_v8  ;;  %v455_v11 = vpop.f32.mrb[1].mxu0  ;;  %v579_v9 = vrot.slane %v1017_v41, %v1393_v30 }
  0xfb   : > { %v457_v12 = vpop.f32.mrb[2].mxu0  ;;  %v456_v14 = vadd.f32 %v455_v11, %v406_v8 }
  0xfc   : > { %v1351_v13 = vmax.f32 %v454_v10, 0.0  ;;  %v458_v15 = vpop.f32.mrb[3].mxu0 }
  0xfd   : > { %v1356_v16 = vmax.f32 %v456_v14, 0.0  ;;  %v1018_v15 = vld [vmem:[%s1587_s1 + $0x6] ss:$8 sm:$0x3] }
  0xfe   : > { %485 = vrot.lane.b32.xlu1 %v1351_v13, %s1579_s25  ;;  %462 = vrot.lane.b32.xlu0 %v1351_v13, %s1208_s29  ;;  %v605_v26 = vrot.slane %v1018_v15, %v1395_v31 }
  0xff   : > { %v565_v22 = vmul.f32 %v561_v62, %v1356_v16 }
 0x102   : > { %507 = vrot.lane.b32.xlu1 %v1351_v13, %s1209_s30  ;;  %487 = vrot.lane.b32.xlu0 %v1356_v16, %s1579_s25  ;;  %s390_s25 = scalar_lea.vmem [#allocation4], %s1008_s24 }
 0x106   : > { %529 = vrot.lane.b32.xlu1 %v1351_v13, %s1210_s12  ;;  %509 = vrot.lane.b32.xlu0 %v1356_v16, %s1209_s30  ;;  %s882_s30 = scalar_lea.sflag [#allocation5], %s1475_s22 }
 0x10a   : > { %464 = vrot.lane.b32.xlu1 %v1356_v16, %s1208_s29  ;;  %531 = vrot.lane.b32.xlu0 %v1356_v16, %s1210_s12  ;;  %s912_s29 = sshll.u32 %s390_s25, 4  ;;  %s913_s29 = int_to_ptr.vmem [resolvable:$true] %s912_s29 }
 0x10b   : > { %s1110_s0 = scalar_lea.vmem %s913_s29, 256 }
 0x10c   : > { %p1111_p11 = scmp.ne.s32.totalorder %s913_s29, %s1110_s0 }
 0x10e   : > { %566 = vrot.lane.b32.xlu1 %v1351_v13, %s1211_s13  ;;  %568 = vrot.lane.b32.xlu0 %v1356_v16, %s1211_s13  ;;  %p1112_p12 = pnand %p1111_p11, %p1316_p5 }
 0x110   : > { %p1113_p13 = pneg %p1112_p12 }
 0x112   : > { %588 = vrot.lane.b32.xlu1 %v1351_v13, %s1212_s14  ;;  %590 = vrot.lane.b32.xlu0 %v1356_v16, %s1212_s14  ;;  %s1039_s14 = sshll.u32 %s1299_s21, 8 }
 0x113   : > { %s1496_s24 = scalar_lea.hbm %s1578_s11, %s1039_s14 }
 0x116   : > { %610 = vrot.lane.b32.xlu1 %v1351_v13, %s1213_s15  ;;  %612 = vrot.lane.b32.xlu0 %v1356_v16, %s1213_s15 }
 0x11a   : > { %632 = vrot.lane.b32.xlu1 %v1351_v13, %s1214_s16  ;;  %634 = vrot.lane.b32.xlu0 %v1356_v16, %s1214_s16 }
 0x11e   : > { %734 = vperm.xlu0 %1106, %v730_v17   ;;  %668 = vperm.xlu1 %1107, %v665_v19   ;;  %v557_v19 = vrot.slane %v1016_v52, %v1393_v30 }
 0x120   : > { %v564_v16 = vmul.f32 %v557_v19, %v1351_v13 }
 0x122   : > { %805 = vperm.xlu0 %1106, %v801_v18   ;;  %739 = vperm.xlu1 %1107, %v731_v20   ;;  %v1019_v18 = vld [vmem:[%s1587_s1 + $0x7] ss:$8 sm:$0x3] }
 0x123   : > { %v623_v32 = vrot.slane %v1019_v18, %v1393_v30  ;;  %v627_v33 = vrot.slane %v1019_v18, %v1395_v31 }
 0x126   : > { %810 = vperm.xlu1 %1107, %v802_v21  }
 0x170   : > { %v486_v23 = vpop.permute.xlu1 %485  ;;  %v463_v24 = vpop.permute.xlu0 %462 }
 0x174   : > { %v508_v27 = vpop.permute.xlu1 %507  ;;  %v488_v28 = vpop.permute.xlu0 %487 }
 0x175   : > { %v490_v39 = vsel %vm489_vm2, %v486_v23, %v488_v28  ;;  %v491_v40 = vsel %vm489_vm2, %v488_v28, %v486_v23  ;;  %v1020_v28 = vld [vmem:[%s1587_s1 + $0x10] ss:$8 sm:$0x3]  ;;  %s1215_s1 = smov [#allocation4]  }
 0x176   : > { %v505_v47 = vmul.f32 %v498_v34, %v491_v40  ;;  %v506_v51 = vmul.f32 %v502_v38, %v490_v39  ;;  %v645_v38 = vrot.slane %v1020_v28, %v1393_v30  ;;  %s1114_s2 = sshll.u32 %s1215_s1, 4  ;;  %s1115_s2 = int_to_ptr.vmem [resolvable:$false] %s1114_s2 }
 0x177   : > { %s1116_s12 = scalar_lea.vmem %s1115_s2, 512  ;;  %p1117_p0 = scmp.lt.s32.totalorder %s913_s29, %s1115_s2 }
 0x178   : > { %v530_v35 = vpop.permute.xlu1 %529  ;;  %v510_v37 = vpop.permute.xlu0 %509  ;;  %p1118_p1 = scmp.lt.s32.totalorder %s1116_s12, %s1110_s0 }
 0x179   : > { %v512_v53 = vsel %vm511_vm3, %v508_v27, %v510_v37  ;;  %v513_v63 = vsel %vm511_vm3, %v510_v37, %v508_v27 }
 0x17a   : > { %v528_v1 = vmul.f32 %v524_v45, %v512_v53  ;;  %v527_v17 = vmul.f32 %v520_v61, %v513_v63  ;;  %p1119_p2 = por %p1118_p1, %p1117_p0 }
 0x17c   : > { %v465_v48 = vpop.permute.xlu1 %464  ;;  %v532_v49 = vpop.permute.xlu0 %531  ;;  %p1120_p3 = pnand %p1119_p2, %p1113_p13 }
 0x17d   : > { %v469_v54 = vsel %vm468_vm4, %v463_v24, %v465_v48  ;;  %v470_v55 = vsel %vm468_vm4, %v465_v48, %v463_v24  ;;  %v534_v56 = vsel %vm533_vm5, %v530_v35, %v532_v49  ;;  %v535_v58 = vsel %vm533_vm5, %v532_v49, %v530_v35 }
 0x17e   : > { %v483_v57 = vmul.f32 %v476_v42, %v470_v55  ;;  %v550_v59 = vmul.f32 %v546_v43, %v534_v56  ;;  %v484_v60 = vmul.f32 %v480_v44, %v469_v54  ;;  %v549_v8 = vmul.f32 %v542_v46, %v535_v58  ;;  %v654_v55 = vld [vmem:[%s1571_s4] sm:$0xf] }
 0x17f   : > { %v601_v24 = vrot.slane %v1018_v15, %v1393_v30  ;;  %v649_v42 = vrot.slane %v1020_v28, %v1395_v31 }
 0x180   : > { %v567_v2 = vpop.permute.xlu1 %566  ;;  %v569_v3 = vpop.permute.xlu0 %568  ;;  %v656_v5 = vpack.c.bf16 %v506_v51, %v484_v60  ;;  %v655_v7 = vpack.c.bf16 %v505_v47, %v483_v57  ;;  %v658_v14 = vpack.c.bf16 %v550_v59, %v528_v1  ;;  %v657_v27 = vpack.c.bf16 %v549_v8, %v527_v17 }
 0x181   : > { %v572_v10 = vsel %vm570_vm6, %v569_v3, %v567_v2  ;;  %v571_v11 = vsel %vm570_vm6, %v567_v2, %v569_v3 }
 0x182   : > { %v587_v12 = vmul.f32 %v583_v50, %v572_v10  ;;  %681 = vmatprep.subr.bf16.mxu1 %v656_v5  ;;  %v586_v23 = vmul.f32 %v579_v9, %v571_v11  ;;  %v1108_v5 = vld [vmem:[%s1573_s6] sm:$0xff]  }
 0x183   : > { %682 = vmatpush1.bf16.msra.mxu1 %v655_v7  ;;  %v1109_v7 = vld [vmem:[%s1575_s8] sm:$0xff]  }
 0x184   : > { %v589_v20 = vpop.permute.xlu1 %588  ;;  %683 = vmatprep.subr.bf16.mxu1 %v658_v14  ;;  %v591_v21 = vpop.permute.xlu0 %590  ;;  %v660_v29 = vpack.c.bf16 %v587_v12, %v565_v22  ;;  %v659_v41 = vpack.c.bf16 %v586_v23, %v564_v16 }
 0x185   : > { %v593_v34 = vsel %vm592_vm7, %v589_v20, %v591_v21  ;;  %v594_v35 = vsel %vm592_vm7, %v591_v21, %v589_v20 }
 0x186   : > { %v608_v43 = vmul.f32 %v601_v24, %v593_v34  ;;  %v609_v44 = vmul.f32 %v605_v26, %v594_v35 }
 0x187   : > { %684 = vmatpush1.bf16.msra.mxu1 %v657_v27 }
 0x188   : > { %v611_v36 = vpop.permute.xlu1 %610  ;;  %685 = vmatprep.subr.bf16.mxu1 %v660_v29  ;;  %v613_v37 = vpop.permute.xlu0 %612 }
 0x189   : > { %v615_v39 = vsel %vm614_vm8, %v611_v36, %v613_v37  ;;  %v616_v40 = vsel %vm614_vm8, %v613_v37, %v611_v36 }
 0x18a   : > { %v630_v45 = vmul.f32 %v623_v32, %v615_v39  ;;  %v631_v46 = vmul.f32 %v627_v33, %v616_v40 }
 0x18b   : > { %686 = vmatpush1.bf16.msra.mxu1 %v659_v41 }
 0x18c   : > { %v633_v47 = vpop.permute.xlu1 %632  ;;  %v635_v48 = vpop.permute.xlu0 %634  ;;  %v662_v13 = vpack.c.bf16 %v631_v46, %v609_v44  ;;  %v661_v49 = vpack.c.bf16 %v630_v45, %v608_v43 }
 0x18d   : > { %v637_v50 = vsel %vm636_vm9, %v633_v47, %v635_v48  ;;  %v638_v30 = vsel %vm636_vm9, %v635_v48, %v633_v47 }
 0x18e   : > { %v652_v51 = vmul.f32 %v645_v38, %v637_v50  ;;  %v653_v52 = vmul.f32 %v649_v42, %v638_v30  ;;  %687 = vmatprep.subr.bf16.mxu1 %v662_v13 }
 0x18f   : > { %688 = vmatpush1.bf16.msra.mxu1 %v661_v49 }
 0x190   : > { %v663_v31 = vpack.c.bf16 %v652_v51, %v652_v51  ;;  %v664_v53 = vpack.c.bf16 %v653_v52, %v653_v52 }
 0x192   : > { %1021 = vmatprep.subr.msk.bf16.mxu1 %vm412_vm0, %v664_v53  ;;  %v676_v54 = vsel %vm412_vm0, %v663_v31, 0 }
 0x193   : > { %690 = vmatpush1.bf16.msra.mxu1 %v676_v54 }
 0x196   : > { %1022 = vmatmul.mubr.msk.bf16.vlgmr.msra.gmra.mrb[0].mxu1 %vm671_vm10, %v654_v55 }
 0x19d   : > { %v669_v25 = vpop.permute.xlu1 %668 }
 0x269   : > { %v715_v56 = vpop.f32.mrb[0].mxu1 }
 0x26a   : > { %v716_v57 = vadd.f32 %v715_v56, %v669_v25  ;;  %v717_v58 = vpop.f32.mrb[1].mxu1 }
 0x26b   : > { %v718_v59 = vadd.f32 %v717_v58, %v669_v25  ;;  %v719_v60 = vpop.f32.mrb[2].mxu1 }
 0x26c   : > { %v722_v61 = vmax.f32 %v716_v57, 0.0  ;;  %v720_v62 = vpop.f32.mrb[3].mxu1 }
 0x26d   : > { %v723_v63 = vmax.f32 %v718_v59, 0.0 }
 0x26e   : > { %724 = vst [vmem:[%s390_s25] sm:$0xff] %v722_v61  ;;  %v728_v1 = vpack.c.bf16 %v722_v61, %v722_v61 }
 0x26f   : > { %725 = vst [vmem:[%s390_s25 + $0x8] sm:$0xff] %v723_v63  ;;  %v729_v2 = vpack.c.bf16 %v723_v63, %v723_v63 }
 0x270   : > { %v751_v3 = vsel %vm412_vm0, %v728_v1, 0 }
 0x271   : > { %1024 = vmatprep.subr.msk.bf16.mxu0 %vm412_vm0, %v729_v2 }
 0x272   : > { %757 = vmatpush1.bf16.msra.mxu0 %v751_v3 }
 0x273   : > { %1027 = vmatprep.subr.msk.bf16.mxu0 %vm412_vm0, %v1338_v4 }
 0x275   : > { %1025 = vmatmul.mubr.msk.bf16.vlgmr.msra.gmra.mrb[4].mxu0 %vm408_vm1, %v1108_v5 }
 0x276   : > { %822 = vmatpush1.bf16.msra.mxu0 %v1343_v6  ;;  %853 = vmatprep.mubr.bf16.mxu0 %v1206_v0 }
 0x281   : > { %1028 = vmatmul.mubr.msk.bf16.vlgmr.msra.gmra.mrb[4].mxu0 %vm408_vm1, %v1109_v7 }
 0x282   : > { %1123 = shalt.err (!%p1120_p3)
}
 0x283   : > { %s1124_s25 = scalar_lea.hbm %s1496_s24, 256  ;;  %s1128_s1 = scalar_lea.hbm %s1578_s11, 512 }
 0x284   : > { %p1125_p4 = scmp.ne.s32.totalorder %s1496_s24, %s1124_s25  ;;  %p1129_p9 = scmp.lt.u32.totalorder %s1496_s24, %s1578_s11 }
 0x285   : > { %p1130_p10 = scmp.lt.u32.totalorder %s1128_s1, %s1124_s25  ;;  %p1132_p12 = scmp.lt.u32.totalorder %s1124_s25, %s1496_s24 }
 0x286   : > { %p1126_p7 = pnand %p1125_p4, %p1316_p5 }
 0x287   : > { %p1131_p11 = por %p1130_p10, %p1129_p9 }
 0x288   : > { %p1127_p8 = pneg %p1126_p7 }
 0x289   : > { %p1133_p13 = por %p1132_p12, %p1131_p11 }
 0x28b   : > { %p1134_p0 = pnand %p1133_p13, %p1127_p8 }
 0x28d   : > { %1137 = shalt.err (!%p1134_p0)
}
 0x28e   : > { %1053 = dma.vmem_to_hbm [thread:$0]  (%p1316_p5), %s913_s29, 256, %s1496_s24, %s882_s30   ;;  %v735_v0 = vpop.permute.xlu0 %734  ;;  %v740_v4 = vpop.permute.xlu1 %739 }
 0x28f   : > { %s1007_s0 = sshll.u32 %s1475_s22, 5  ;;  %s1038_s24 = sshll.u32 %s1299_s21, 9 }
 0x290   : > { %s383_s16 = scalar_lea.vmem [#allocation2], %s1007_s0  ;;  %s1523_s25 = scalar_lea.hbm %s1577_s10, %s1038_s24 }
 0x291   : > { %s895_s12 = sshll.u32 %s383_s16, 4  ;;  %s877_s13 = scalar_lea.sflag [#allocation3], %s1475_s22  ;;  %s1518_s12 = int_to_ptr.vmem [resolvable:$true] %s895_s12 }
 0x292   : > { %v806_v6 = vpop.permute.xlu0 %805  ;;  %v811_v8 = vpop.permute.xlu1 %810  ;;  %s1138_s21 = scalar_lea.vmem %s1518_s12, 512  ;;  %s1216_s14 = smov [#allocation2]  }
 0x293   : > { %v1040_v9 = vadd.f32 %v806_v6, %v735_v0  ;;  %v1044_v11 = vadd.f32 %v811_v8, %v740_v4  ;;  %p1139_p1 = scmp.ne.s32.totalorder %s1518_s12, %s1138_s21  ;;  %s1142_s1 = sshll.u32 %s1216_s14, 4  ;;  %s1143_s1 = int_to_ptr.vmem [resolvable:$false] %s1142_s1 }
 0x294   : > { %s1144_s15 = scalar_lea.vmem %s1143_s1, 1024  ;;  %p1145_p4 = scmp.lt.s32.totalorder %s1518_s12, %s1143_s1 }
 0x295   : > { %p1140_p2 = pnand %p1139_p1, %p1316_p5  ;;  %p1146_p7 = scmp.lt.s32.totalorder %s1144_s15, %s1138_s21 }
 0x297   : > { %p1141_p3 = pneg %p1140_p2  ;;  %p1147_p8 = por %p1146_p7, %p1145_p4 }
 0x299   : > { %p1148_p9 = pnand %p1147_p8, %p1141_p3 }
 0x354   : > { %v855_v10 = vpop.f32.mrb[4].mxu0 }
 0x355   : > { %v1041_v12 = vadd.f32 %v1040_v9, %v855_v10  ;;  %v857_v14 = vpop.f32.mrb[5].mxu0 }
 0x356   : > { %v1043_v15 = vadd.f32 %v1040_v9, %v857_v14  ;;  %v859_v17 = vpop.f32.mrb[6].mxu0 }
 0x357   : > { %v868_v18 = vmax.f32 %v1041_v12, 0.0  ;;  %v1045_v19 = vadd.f32 %v1044_v11, %v859_v17  ;;  %v861_v20 = vpop.f32.mrb[7].mxu0 }
 0x358   : > { %v869_v21 = vmax.f32 %v1043_v15, 0.0  ;;  %v1047_v22 = vadd.f32 %v1044_v11, %v861_v20 }
 0x359   : > { %872 = vst [vmem:[%s383_s16] sm:$0xff] %v868_v18  ;;  %v870_v23 = vmax.f32 %v1045_v19, 0.0 }
 0x35a   : > { %873 = vst [vmem:[%s383_s16 + $0x8] sm:$0xff] %v869_v21  ;;  %v871_v24 = vmax.f32 %v1047_v22, 0.0 }
 0x35b   : > { %874 = vst [vmem:[%s383_s16 + $0x10] sm:$0xff] %v870_v23 }
 0x35c   : > { %875 = vst [vmem:[%s383_s16 + $0x18] sm:$0xff] %v871_v24 }
 0x35d   : > { %1151 = shalt.err (!%p1148_p9)
}
 0x35e   : > { %s1152_s2 = scalar_lea.hbm %s1523_s25, 512  ;;  %s1156_s24 = scalar_lea.hbm %s1577_s10, 1024 }
 0x35f   : > { %p1153_p10 = scmp.ne.s32.totalorder %s1523_s25, %s1152_s2  ;;  %p1157_p13 = scmp.lt.u32.totalorder %s1523_s25, %s1577_s10 }
 0x360   : > { %p1158_p0 = scmp.lt.u32.totalorder %s1156_s24, %s1152_s2  ;;  %p1160_p2 = scmp.lt.u32.totalorder %s1152_s2, %s1523_s25 }
 0x361   : > { %p1154_p11 = pnand %p1153_p10, %p1316_p5 }
 0x362   : > { %p1159_p1 = por %p1158_p0, %p1157_p13 }
 0x363   : > { %p1155_p12 = pneg %p1154_p11 }
 0x364   : > { %p1161_p3 = por %p1160_p2, %p1159_p1 }
 0x366   : > { %p1162_p4 = pnand %p1161_p3, %p1155_p12 }
 0x368   : > { %1165 = shalt.err (!%p1162_p4)
}
 0x369   : > { %s1217_s21 = smov 256   ;;  %s1588_s14 = smov 16  }
 0x36a   : > { %1052 = dma.vmem_to_hbm [thread:$0]  (%p1316_p5), %s1518_s12, 512, %s1523_s25, %s877_s13, %s1217_s21, %s1217_s21, %s1588_s14  }
 0x36b PF: > { %p1063_p7 = scmp.ge.s32.totalorder %s1204_s20, 2  ;;  %s924_s1 = sand.u32 1, %s1192_s17  }
 0x36c   : > { %s925_s15 = scalar_lea.sflag [#allocation3], %s924_s1 }
 0x36d   : > { %p1057_p8 = pnand %p1063_p7, %p1320_p6 }
 0x36f   : > { %1183 = dma.done.wait (!%p1057_p8), %s925_s15, 512  }
 0x370   : > { %1185 = vsyncadd (!%p1057_p8), %s925_s15, 4294966784  ;;  %s934_s2 = scalar_lea.sflag [#allocation5], %s924_s1 }
 0x371   : > { %1187 = dma.done.wait (!%p1057_p8), %s934_s2, 256  }
 0x372   : > { %1189 = vsyncadd (!%p1057_p8), %s934_s2, 4294967040  ;;  %p25_p5 = scmp.ge.s32.totalorder %s1303_s23, 4   ;;  %s1589_s17 = smov %s1196_s18 }
 0x373   : > { %s1590_s18 = smov %s1200_s19  ;;  %s1591_s19 = smov %s1314_s26 }
 0x374   : > { %s1592_s20 = smov %s1303_s23  ;;  %27 = sbr.rel (!%p25_p5) target bundleno = 9 (0x9), region = 120 }
 0x37b   :  { %939 = vsyncpa [#allocation3], 1 }
 0x37c   :  { %941 = vsyncpa [#allocation3 + $0x1], 1 }
 0x37d   :  { %942 = vsyncpa [#allocation5], 1 }
 0x37e   :  { %944 = vsyncpa [#allocation5 + $0x1], 1 }

</bundles_post_ra>
